<compile_context>
chip_gen: v6e
topology: v6e:2x2x1
jax: 0.10.0
libtpu: 0.0.40
codegen_flags: <defaults>
</compile_context>

<pallas_src>
import jax
import jax.numpy as jnp
from jax.experimental import pallas as pl
from jax.experimental.pallas import tpu as pltpu


def _round_up(n, m):
    return ((n + m - 1) // m) * m


def _pad_to(a, shape):
    pads = [(0, t - s) for s, t in zip(a.shape, shape)]
    if all(p == (0, 0) for p in pads):
        return a
    return jnp.pad(a, pads)


def _resident_spec(block_shape):
    """Constant-index (resident) BlockSpec with a single buffer if supported."""
    try:
        return pl.BlockSpec(block_shape, lambda i: (0, 0),
                            pipeline_mode=pl.Buffered(1))
    except (TypeError, AttributeError):
        return pl.BlockSpec(block_shape, lambda i: (0, 0))


def _mlp_kernel(x_ref, w1_ref, b1_ref, w2_ref, b2_ref, w3_ref, b3_ref, o_ref):
    # Matmuls hit the MXU with bf16 operands / f32 accumulation;
    # bias-add + ReLU run on the VPU in f32, fully fused in VMEM.
    x = x_ref[...]                                                     # bf16 (tb, D_in)
    h1 = jnp.dot(x, w1_ref[...], preferred_element_type=jnp.float32)   # f32 (tb, H1p)
    h1 = jnp.maximum(h1 + b1_ref[...], 0.0).astype(jnp.bfloat16)
    h2 = jnp.dot(h1, w2_ref[...], preferred_element_type=jnp.float32)  # f32 (tb, H2p)
    h2 = jnp.maximum(h2 + b2_ref[...], 0.0).astype(jnp.bfloat16)
    # dropout (eval mode) == identity
    out = jnp.dot(h2, w3_ref[...], preferred_element_type=jnp.float32) + b3_ref[...]
    o_ref[...] = out.astype(o_ref.dtype)                               # lane-dense (tb, Cp)


def prepare_params(w1, b1, w2, b2, w3, b3):
    """One-time weight prep (hoisted out of the per-call forward path).

    Weights are stored transposed relative to PyTorch (in_features, out_features):
    the kernel computes x @ W + b == x @ W_pt.T + b_pt.
      * output (N) dims padded to multiples of 128 (lane-dense MXU columns),
      * w2/w3 K dims padded to match the padded h1/h2 intermediates,
      * w1 K dim left at D_in (x is streamed unpadded; Mosaic pads K in vregs),
      * weights cast to bf16 (MXU-native), biases kept f32 (added to f32 acc).
    Zero padding + ReLU(0)==0 keeps the real output columns exact.
    """
    D_in, H1 = w1.shape
    H2 = w2.shape[1]
    C = w3.shape[1]
    H1p, H2p, Cp = (_round_up(d, 128) for d in (H1, H2, C))

    w1_p = _pad_to(w1, (D_in, H1p)).astype(jnp.bfloat16)
    w2_p = _pad_to(w2, (H1p, H2p)).astype(jnp.bfloat16)
    w3_p = _pad_to(w3, (H2p, Cp)).astype(jnp.bfloat16)
    b1_p = _pad_to(b1.reshape(1, -1), (1, H1p)).astype(jnp.float32)
    b2_p = _pad_to(b2.reshape(1, -1), (1, H2p)).astype(jnp.float32)
    b3_p = _pad_to(b3.reshape(1, -1), (1, Cp)).astype(jnp.float32)

    meta = {"D_in": D_in, "num_classes": C, "H1p": H1p, "H2p": H2p, "Cp": Cp}
    return (w1_p, b1_p, w2_p, b2_p, w3_p, b3_p), meta


def _pick_batch_tile(B, batch_tile):
    if batch_tile is not None:
        return max(16, _round_up(batch_tile, 16))
    if B <= 256:
        # Small batch: single tile, multiple of 16 for bf16 (16,128) packing.
        return max(16, _round_up(B, 16))
    if B < 4 * 512:
        # MXU-row aligned (256x256 on v6e/v7x; 128x128 divides it on v5e),
        # grid has >= 2 steps so x/out DMA pipelines with compute.
        return 256
    # Large batch: 512-row tiles still leave >= 4 grid steps (v7x dual-TC
    # sharding keeps >= 2 pipelined steps per core).
    return 512


def deeper_mlp_forward(x, prepared, meta, *, batch_tile=None, training=False):
    """x: (B, D_in) f32. prepared/meta from prepare_params(). Returns (B, C) f32."""
    if training:
        # TODO(synk): training-mode dropout (prng mask + 1/(1-p) scale) not implemented.
        raise NotImplementedError("deeper_mlp_forward implements eval-mode dropout only")

    B, D_in = x.shape
    assert D_in == meta["D_in"]
    C, H1p, H2p, Cp = meta["num_classes"], meta["H1p"], meta["H2p"], meta["Cp"]
    w1_p, b1_p, w2_p, b2_p, w3_p, b3_p = prepared

    tb = _pick_batch_tile(B, batch_tile)
    Bp = _round_up(B, tb)
    grid = (Bp // tb,)

    # x: cast to bf16 (one pass), pad the batch dim only. Feature dim stays
    # D_in (full-extent last dim in the BlockSpec) -> no wasted HBM bandwidth.
    x_p = _pad_to(x, (Bp, D_in)).astype(jnp.bfloat16)

    # --- VMEM budget ---------------------------------------------------------
    bf16_b, f32_b = 2, 4
    D_lane = _round_up(D_in, 128)   # lane-padded layout of the x tile in VMEM
    D_sub8 = _round_up(D_in, 8)     # sublane-padded layout of w1's K dim
    vmem_needed = (
        2 * tb * D_lane * bf16_b                              # x tile (double-buffered)
        + 2 * tb * Cp * f32_b                                 # out tile (double-buffered)
        + (D_sub8 * H1p + H1p * H2p + H2p * Cp) * bf16_b      # resident weights (Buffered(1))
        + 8 * (H1p + H2p + Cp) * f32_b                        # biases (sublane-padded)
        + tb * (H1p + H2p) * f32_b                            # f32 h1/h2 accumulators
        + tb * (H1p + H2p) * bf16_b                           # simultaneous bf16 h1/h2 copies
    )
    try:
        phys_vmem = int(getattr(pltpu.get_tpu_info(), "vmem_capacity_bytes", 64 << 20))
    except Exception:
        phys_vmem = 64 << 20                                  # conservative (v7x per-TC)
    vmem_cap = int(0.85 * phys_vmem)                          # headroom for Mosaic scratch/sems
    vmem_limit = int(min(max(int(1.5 * vmem_needed), 32 << 20), vmem_cap))

    # --- cost hint for the XLA scheduler -------------------------------------
    flops = 2 * Bp * (D_in * H1p + H1p * H2p + H2p * Cp)
    bytes_accessed = (
        Bp * D_in * bf16_b + Bp * Cp * f32_b
        + (D_in * H1p + H1p * H2p + H2p * Cp) * bf16_b
        + (H1p + H2p + Cp) * f32_b
    )
    cost = pl.CostEstimate(flops=flops, transcendentals=0,
                           bytes_accessed=int(bytes_accessed))

    out_padded = pl.pallas_call(
        _mlp_kernel,
        out_shape=jax.ShapeDtypeStruct((Bp, Cp), jnp.float32),
        grid_spec=pltpu.PrefetchScalarGridSpec(
            num_scalar_prefetch=0,
            grid=grid,
            in_specs=[
                pl.BlockSpec((tb, D_in), lambda i: (i, 0)),   # x: streamed over batch
                _resident_spec((D_in, H1p)),                  # weights/biases: constant
                _resident_spec((1, H1p)),                     #   block index, single
                _resident_spec((H1p, H2p)),                   #   buffer, loaded once
                _resident_spec((1, H2p)),
                _resident_spec((H2p, Cp)),
                _resident_spec((1, Cp)),
            ],
            out_specs=pl.BlockSpec((tb, Cp), lambda i: (i, 0)),
        ),
        compiler_params=pltpu.CompilerParams(
            dimension_semantics=("parallel",),
            vmem_limit_bytes=vmem_limit,
        ),
        cost_estimate=cost,
    )(x_p, w1_p, b1_p, w2_p, b2_p, w3_p, b3_p)

    # Slice back to the real batch / class dims (drops lane-padding columns).
    return out_padded[:B, :C]


def init_params(key, input_dim, hidden_dim1, hidden_dim2, num_classes):
    """Deterministic init mimicking nn.Linear default (uniform(-1/sqrt(fan_in), +))."""
    def linear(k, fan_in, fan_out):
        kw, kb = jax.random.split(k)
        bound = 1.0 / jnp.sqrt(fan_in)
        w = jax.random.uniform(kw, (fan_in, fan_out), jnp.float32, -bound, bound)
        b = jax.random.uniform(kb, (1, fan_out), jnp.float32, -bound, bound)
        return w, b

    k1, k2, k3 = jax.random.split(key, 3)
    w1, b1 = linear(k1, input_dim, hidden_dim1)
    w2, b2 = linear(k2, hidden_dim1, hidden_dim2)
    w3, b3 = linear(k3, hidden_dim2, num_classes)
    return (w1, b1, w2, b2, w3, b3)


if __name__ == "__main__":
    # Small shapes consistent with an MLP forward (overhead-bound at this size;
    # the tiling/padding wins only materialize at production batch sizes).
    B, D_IN, H1, H2, NUM_CLASSES = 8, 32, 64, 48, 10

    key = jax.random.PRNGKey(0)
    kx, kp = jax.random.split(key)
    x = jax.random.normal(kx, (B, D_IN), dtype=jnp.float32)
    params = init_params(kp, D_IN, H1, H2, NUM_CLASSES)

    # Weight pad + bf16 cast happens once here, not per forward call.
    prepared, meta = prepare_params(*params)

    out = deeper_mlp_forward(x, prepared, meta)
    out = jax.block_until_ready(out)

    # Pure-JAX f32 reference (eval-mode dropout == identity). Kernel uses bf16
    # operands with f32 accumulation, so compare with a bf16-appropriate tolerance.
    w1, b1, w2, b2, w3, b3 = params
    ref = jnp.maximum(x @ w1 + b1, 0.0)
    ref = jnp.maximum(ref @ w2 + b2, 0.0)
    ref = ref @ w3 + b3

    assert out.shape == (B, NUM_CLASSES)
    assert bool(jnp.allclose(out, ref, atol=5e-2, rtol=5e-2)), (
        f"max abs err {float(jnp.max(jnp.abs(out - ref)))}"
    )

    print("KERNEL_OK")
</pallas_src>

<mosaic_0001>
module attributes {stable_mosaic.version = 11 : i64} {
  func.func @_mlp_kernel(%arg0: i32, %arg1: memref<16x32xbf16, #tpu.memory_space<vmem>>, %arg2: memref<32x128xbf16, #tpu.memory_space<vmem>>, %arg3: memref<1x128xf32, #tpu.memory_space<vmem>>, %arg4: memref<128x128xbf16, #tpu.memory_space<vmem>>, %arg5: memref<1x128xf32, #tpu.memory_space<vmem>>, %arg6: memref<128x128xbf16, #tpu.memory_space<vmem>>, %arg7: memref<1x128xf32, #tpu.memory_space<vmem>>, %arg8: memref<16x128xf32, #tpu.memory_space<vmem>>) attributes {dimension_semantics = [#tpu.dimension_semantics<parallel>], iteration_bounds = array<i64: 1>, scalar_prefetch = 0 : i64, scratch_operands = 0 : i64, tpu.core_type = #tpu.core_type<tc>, window_params = [{transform_indices = @transform_0, window_bounds = array<i64: 16, 32>}, {pipeline_mode = #tpu.pipeline_mode<synchronous>, transform_indices = @transform_1, window_bounds = array<i64: 32, 128>}, {pipeline_mode = #tpu.pipeline_mode<synchronous>, transform_indices = @transform_2, window_bounds = array<i64: 1, 128>}, {pipeline_mode = #tpu.pipeline_mode<synchronous>, transform_indices = @transform_3, window_bounds = array<i64: 128, 128>}, {pipeline_mode = #tpu.pipeline_mode<synchronous>, transform_indices = @transform_4, window_bounds = array<i64: 1, 128>}, {pipeline_mode = #tpu.pipeline_mode<synchronous>, transform_indices = @transform_5, window_bounds = array<i64: 128, 128>}, {pipeline_mode = #tpu.pipeline_mode<synchronous>, transform_indices = @transform_6, window_bounds = array<i64: 1, 128>}, {transform_indices = @transform_7, window_bounds = array<i64: 16, 128>}]} {
    %c0 = arith.constant 0 : index
    %c0_0 = arith.constant 0 : index
    %0 = vector.load %arg1[%c0, %c0_0] : memref<16x32xbf16, #tpu.memory_space<vmem>>, vector<16x32xbf16>
    %c0_1 = arith.constant 0 : index
    %c0_2 = arith.constant 0 : index
    %1 = vector.load %arg2[%c0_1, %c0_2] : memref<32x128xbf16, #tpu.memory_space<vmem>>, vector<32x128xbf16>
    %cst = arith.constant dense<0.000000e+00> : vector<16x128xf32>
    %2 = tpu.matmul %0, %1, %cst {dimension_numbers = #tpu.dot_dimension_numbers<[1], [0], [0], [1], [0, 0, 1, 1], [], []>} : vector<16x32xbf16>, vector<32x128xbf16>, vector<16x128xf32> -> vector<16x128xf32>
    %c0_3 = arith.constant 0 : index
    %c0_4 = arith.constant 0 : index
    %3 = vector.load %arg3[%c0_3, %c0_4] : memref<1x128xf32, #tpu.memory_space<vmem>>, vector<1x128xf32>
    %4 = vector.broadcast %3 : vector<1x128xf32> to vector<16x128xf32>
    %5 = arith.addf %2, %4 : vector<16x128xf32>
    %cst_5 = arith.constant 0.000000e+00 : f32
    %6 = vector.broadcast %cst_5 : f32 to vector<16x128xf32>
    %7 = arith.maximumf %5, %6 : vector<16x128xf32>
    %8 = arith.truncf %7 : vector<16x128xf32> to vector<16x128xbf16>
    %c0_6 = arith.constant 0 : index
    %c0_7 = arith.constant 0 : index
    %9 = vector.load %arg4[%c0_6, %c0_7] : memref<128x128xbf16, #tpu.memory_space<vmem>>, vector<128x128xbf16>
    %cst_8 = arith.constant dense<0.000000e+00> : vector<16x128xf32>
    %10 = tpu.matmul %8, %9, %cst_8 {dimension_numbers = #tpu.dot_dimension_numbers<[1], [0], [0], [1], [0, 0, 1, 1], [], []>} : vector<16x128xbf16>, vector<128x128xbf16>, vector<16x128xf32> -> vector<16x128xf32>
    %c0_9 = arith.constant 0 : index
    %c0_10 = arith.constant 0 : index
    %11 = vector.load %arg5[%c0_9, %c0_10] : memref<1x128xf32, #tpu.memory_space<vmem>>, vector<1x128xf32>
    %12 = vector.broadcast %11 : vector<1x128xf32> to vector<16x128xf32>
    %13 = arith.addf %10, %12 : vector<16x128xf32>
    %cst_11 = arith.constant 0.000000e+00 : f32
    %14 = vector.broadcast %cst_11 : f32 to vector<16x128xf32>
    %15 = arith.maximumf %13, %14 : vector<16x128xf32>
    %16 = arith.truncf %15 : vector<16x128xf32> to vector<16x128xbf16>
    %c0_12 = arith.constant 0 : index
    %c0_13 = arith.constant 0 : index
    %17 = vector.load %arg6[%c0_12, %c0_13] : memref<128x128xbf16, #tpu.memory_space<vmem>>, vector<128x128xbf16>
    %cst_14 = arith.constant dense<0.000000e+00> : vector<16x128xf32>
    %18 = tpu.matmul %16, %17, %cst_14 {dimension_numbers = #tpu.dot_dimension_numbers<[1], [0], [0], [1], [0, 0, 1, 1], [], []>} : vector<16x128xbf16>, vector<128x128xbf16>, vector<16x128xf32> -> vector<16x128xf32>
    %c0_15 = arith.constant 0 : index
    %c0_16 = arith.constant 0 : index
    %19 = vector.load %arg7[%c0_15, %c0_16] : memref<1x128xf32, #tpu.memory_space<vmem>>, vector<1x128xf32>
    %20 = vector.broadcast %19 : vector<1x128xf32> to vector<16x128xf32>
    %21 = arith.addf %18, %20 : vector<16x128xf32>
    %c0_17 = arith.constant 0 : index
    %c0_18 = arith.constant 0 : index
    %22 = vector.load %arg8[%c0_17, %c0_18] : memref<16x128xf32, #tpu.memory_space<vmem>>, vector<16x128xf32>
    tpu.vector_store %arg8[%c0_17, %c0_18], %21 {strides = array<i32>} : memref<16x128xf32, #tpu.memory_space<vmem>>, vector<16x128xf32>,
    return
  }
  func.func @transform_0(%arg0: i32) -> (i32, i32) {
    %c0_i32 = arith.constant 0 : i32
    %c0_i32_0 = arith.constant 0 : i32
    return %arg0, %c0_i32 : i32, i32
  }
  func.func @transform_1(%arg0: i32) -> (i32, i32) {
    %c0_i32 = arith.constant 0 : i32
    %c0_i32_0 = arith.constant 0 : i32
    %c0_i32_1 = arith.constant 0 : i32
    return %c0_i32, %c0_i32_0 : i32, i32
  }
  func.func @transform_2(%arg0: i32) -> (i32, i32) {
    %c0_i32 = arith.constant 0 : i32
    %c0_i32_0 = arith.constant 0 : i32
    %c0_i32_1 = arith.constant 0 : i32
    return %c0_i32, %c0_i32_0 : i32, i32
  }
  func.func @transform_3(%arg0: i32) -> (i32, i32) {
    %c0_i32 = arith.constant 0 : i32
    %c0_i32_0 = arith.constant 0 : i32
    %c0_i32_1 = arith.constant 0 : i32
    return %c0_i32, %c0_i32_0 : i32, i32
  }
  func.func @transform_4(%arg0: i32) -> (i32, i32) {
    %c0_i32 = arith.constant 0 : i32
    %c0_i32_0 = arith.constant 0 : i32
    %c0_i32_1 = arith.constant 0 : i32
    return %c0_i32, %c0_i32_0 : i32, i32
  }
  func.func @transform_5(%arg0: i32) -> (i32, i32) {
    %c0_i32 = arith.constant 0 : i32
    %c0_i32_0 = arith.constant 0 : i32
    %c0_i32_1 = arith.constant 0 : i32
    return %c0_i32, %c0_i32_0 : i32, i32
  }
  func.func @transform_6(%arg0: i32) -> (i32, i32) {
    %c0_i32 = arith.constant 0 : i32
    %c0_i32_0 = arith.constant 0 : i32
    %c0_i32_1 = arith.constant 0 : i32
    return %c0_i32, %c0_i32_0 : i32, i32
  }
  func.func @transform_7(%arg0: i32) -> (i32, i32) {
    %c0_i32 = arith.constant 0 : i32
    %c0_i32_0 = arith.constant 0 : i32
    return %arg0, %c0_i32 : i32, i32
  }
}

</mosaic_0001>

<bundles_post_ra>
// kernel: tpu_custom_call.1
= control target key start
LH: loop header
LB: loop body
LE: loop exit
PB: predicated region body
PF: predicated region fallthrough
CT: control target
= control target key end

     0   :  { %12 = vsyncpa [#allocation3], 0  ;;  %s750_s0 = inlined_call_operand.hbm [shape: bf16[16,32], index: 0, kind: input, shape index: {}]   ;;  %s751_s1 = inlined_call_operand.hbm [shape: bf16[32,128], index: 1, kind: input, shape index: {}]   ;;  %s752_s2 = inlined_call_operand.vmem [shape: f32[1,128], index: 2, kind: input, shape index: {}]   ;;  %s753_s3 = inlined_call_operand.hbm [shape: bf16[128,128], index: 3, kind: input, shape index: {}]   ;;  %s754_s4 = inlined_call_operand.vmem [shape: f32[1,128], index: 4, kind: input, shape index: {}]   ;;  %s755_s5 = inlined_call_operand.hbm [shape: bf16[128,128], index: 5, kind: input, shape index: {}]   ;;  %s756_s6 = inlined_call_operand.vmem [shape: f32[1,128], index: 6, kind: input, shape index: {}]   ;;  %s757_s7 = inlined_call_operand.hbm [shape: f32[16,128], index: 7, kind: output, shape index: {}]  }
   0x1   :  { %13 = vsyncpa [#allocation6], 0 }
   0x2   :  { %14 = vsyncpa [#allocation9], 0 }
   0x3   :  { %15 = vsyncpa [#allocation4], 0  ;;  %s639_s24 = smov [#allocation5]   ;;  %s640_s26 = smov [#allocation2]  }
   0x4   :  { %s33_s25 = sshll.u32 %s639_s24, 4  ;;  %s21_s27 = sshll.u32 %s640_s26, 4  ;;  %s34_s25 = int_to_ptr.vmem [resolvable:$true] %s33_s25  ;;  %s22_s27 = int_to_ptr.vmem [resolvable:$true] %s21_s27 }
   0x5   :  { %s539_s28 = scalar_lea.vmem %s34_s25, 256  ;;  %p544_p1 = scmp.lt.s32.totalorder %s34_s25, %s34_s25 }
   0x6   :  { %p540_p0 = scmp.ne.s32.totalorder %s34_s25, %s539_s28  ;;  %p545_p2 = scmp.lt.s32.totalorder %s539_s28, %s539_s28 }
   0x8   :  { %p546_p3 = por %p545_p2, %p544_p1 }
   0xa   :  { %p547_p4 = pnand %p546_p3, %p540_p0 }
   0xc   :  { %550 = shalt.err (!%p547_p4)
}
   0xd   :  { %s641_s29 = smov 64   ;;  %s642_s30 = smov 4  }
   0xe   :  { %39 = dma.hbm_to_vmem [thread:$0]  %s751_s1, 256, %s34_s25, [#allocation6], %s641_s29, %s641_s29, %s642_s30  }
   0xf   :  { %s559_s10 = scalar_lea.vmem %s22_s27, 128  ;;  %p564_p6 = scmp.lt.s32.totalorder %s22_s27, %s22_s27 }
  0x10   :  { %p560_p5 = scmp.ne.s32.totalorder %s22_s27, %s559_s10  ;;  %p565_p7 = scmp.lt.s32.totalorder %s559_s10, %s559_s10 }
  0x12   :  { %p566_p8 = por %p565_p7, %p564_p6 }
  0x14   :  { %p567_p9 = pnand %p566_p8, %p560_p5 }
  0x16   :  { %570 = shalt.err (!%p567_p9)
}
  0x17   :  { %27 = dma.hbm_to_vmem [thread:$0]  %s750_s0, 128, %s22_s27, [#allocation3], %s641_s29, %s641_s29, %s642_s30  }
  0x18   :  { %s643_s13 = smov [#allocation7]   ;;  %s644_s15 = smov [#allocation8]  }
  0x19   :  { %s47_s14 = sshll.u32 %s643_s13, 4  ;;  %s61_s16 = sshll.u32 %s644_s15, 4  ;;  %s48_s14 = int_to_ptr.vmem [resolvable:$true] %s47_s14  ;;  %s62_s16 = int_to_ptr.vmem [resolvable:$true] %s61_s16 }
  0x1a   :  { %s579_s1 = scalar_lea.vmem %s48_s14, 1024  ;;  %p584_p11 = scmp.lt.s32.totalorder %s48_s14, %s48_s14 }
  0x1b   :  { %p580_p10 = scmp.ne.s32.totalorder %s48_s14, %s579_s1  ;;  %p585_p12 = scmp.lt.s32.totalorder %s579_s1, %s579_s1 }
  0x1d   :  { %p586_p13 = por %p585_p12, %p584_p11 }
  0x1f   :  { %p587_p0 = pnand %p586_p13, %p580_p10 }
  0x21   :  { %590 = shalt.err (!%p587_p0)
}
  0x22   :  { %53 = dma.hbm_to_vmem [thread:$0]  %s753_s3, 1024, %s48_s14, [#allocation6], %s641_s29, %s641_s29, %s642_s30  }
  0x23   :  { %s599_s0 = scalar_lea.vmem %s62_s16, 1024  ;;  %p604_p2 = scmp.lt.s32.totalorder %s62_s16, %s62_s16 }
  0x24   :  { %p600_p1 = scmp.ne.s32.totalorder %s62_s16, %s599_s0  ;;  %p605_p3 = scmp.lt.s32.totalorder %s599_s0, %s599_s0 }
  0x26   :  { %p606_p4 = por %p605_p3, %p604_p2 }
  0x28   :  { %p607_p5 = pnand %p606_p4, %p600_p1 }
  0x2a   :  { %610 = shalt.err (!%p607_p5)
}
  0x2b   :  { %67 = dma.hbm_to_vmem [thread:$0]  %s755_s5, 1024, %s62_s16, [#allocation9], %s641_s29, %s641_s29, %s642_s30  }
  0x2c   :  { %631 = dma.done.wait [#allocation3], 128  }
  0x2d   :  { %632 = vsyncadd [#allocation3], 4294967168 }
  0x2e   :  { %633 = dma.done.wait [#allocation6], 1280  }
  0x2f   :  { %634 = vsyncadd [#allocation6], 4294966016 }
  0x30   :  { %635 = dma.done.wait [#allocation9], 1024  }
  0x31   :  { %636 = vsyncadd [#allocation9], 4294966272  ;;  %v645_v0 = vmov 0.0   ;;  %vm646_vm0 = vmmov 0   ;;  %v512_v1 = vld [vmem:[#allocation5 + $0x8] sm:$0xff]   ;;  %v513_v2 = vld [vmem:[#allocation5] sm:$0xff]  }
  0x32   :  { %453 = vmatprep.subr.bf16.mxu0 %v645_v0  ;;  %457 = vmatprep.mubr.msk.bf16.mxu0 %vm646_vm0, %v645_v0  ;;  %v515_v3 = vld [vmem:[#allocation7 + $0x38] sm:$0xff]   ;;  %v514_v4 = vld [vmem:[#allocation2] sm:$0xff]   ;;  %v516_v5 = vld [vmem:[#allocation7 + $0x30] sm:$0xff]   ;;  %vm113_vm1 = vcmask 261120   ;;  %s647_s24 = smov [#allocation10]  }
  0x33   :  { %461 = vmatprep.subr.bf16.mxu1 %v645_v0  ;;  %477 = vmatprep.mubr.msk.bf16.mxu1 %vm646_vm0, %v645_v0  ;;  %v517_v6 = vld [vmem:[#allocation7 + $0x28] sm:$0xff]   ;;  %v518_v7 = vld [vmem:[#allocation7 + $0x20] sm:$0xff]   ;;  %v519_v8 = vld [vmem:[#allocation7 + $0x18] sm:$0xff]   ;;  %s395_s25 = sshll.u32 %s647_s24, 4  ;;  %s396_s25 = int_to_ptr.vmem [resolvable:$true] %s395_s25 }
  0x34   :  { %454 = vmatpush3.bf16.msra.mxu0 %v512_v1  ;;  %462 = vmatpush3.bf16.msra.mxu1 %v515_v3  ;;  %v520_v9 = vld [vmem:[#allocation7 + $0x10] sm:$0xff]   ;;  %v521_v10 = vld [vmem:[#allocation7 + $0x8] sm:$0xff]   ;;  %v522_v11 = vld [vmem:[#allocation7] sm:$0xff]   ;;  %p616_p7 = scmp.lt.s32.totalorder %s396_s25, %s396_s25 }
  0x35   :  { %455 = vmatprep.subr.bf16.mxu0 %v645_v0  ;;  %463 = vmatprep.subr.bf16.mxu1 %v645_v0  ;;  %v523_v12 = vld [vmem:[#allocation8 + $0x38] sm:$0xff]   ;;  %v524_v13 = vld [vmem:[#allocation8 + $0x30] sm:$0xff]   ;;  %v525_v14 = vld [vmem:[#allocation8 + $0x28] sm:$0xff]  }
  0x36   :  { %v526_v15 = vld [vmem:[#allocation8 + $0x20] sm:$0xff]   ;;  %v527_v16 = vld [vmem:[#allocation8 + $0x18] sm:$0xff]   ;;  %v409_v17 = vld [vmem:[%s752_s2] ss:$0 sm:$0xff] }
  0x37   :  { %v528_v27 = vld [vmem:[#allocation8 + $0x10] sm:$0xff]   ;;  %v529_v28 = vld [vmem:[#allocation8 + $0x8] sm:$0xff]   ;;  %v530_v29 = vld [vmem:[#allocation8] sm:$0xff]  }
  0x38   :  { %456 = vmatpush3.bf16.msra.mxu0 %v513_v2  ;;  %464 = vmatpush3.bf16.msra.mxu1 %v516_v5  ;;  %v414_v30 = vld [vmem:[%s754_s4] ss:$0 sm:$0xff]  ;;  %s611_s4 = scalar_lea.vmem %s396_s25, 256 }
  0x39   :  { %481 = vmatprep.subr.bf16.mxu0 %v645_v0  ;;  %465 = vmatprep.subr.bf16.mxu1 %v645_v0  ;;  %v423_v40 = vld [vmem:[%s756_s6] ss:$0 sm:$0xff]  ;;  %p612_p6 = scmp.ne.s32.totalorder %s396_s25, %s611_s4  ;;  %p617_p8 = scmp.lt.s32.totalorder %s611_s4, %s611_s4 }
  0x3b   :  { %458 = vmatmul.mubr.msk.bf16.vlgmr.msra.gmra.mxu0 %vm113_vm1, %v514_v4  ;;  %p618_p9 = por %p617_p8, %p616_p7 }
  0x3c   :  { %497 = vmatprep.mubr.msk.bf16.mxu0 %vm646_vm0, %v645_v0  ;;  %466 = vmatpush3.bf16.msra.mxu1 %v517_v6 }
  0x3d   :  { %467 = vmatprep.subr.bf16.mxu1 %v645_v0  ;;  %482 = vmatpush3.bf16.msra.mxu0 %v523_v12  ;;  %p619_p10 = pnand %p618_p9, %p612_p6 }
  0x3e   :  { %483 = vmatprep.subr.bf16.mxu0 %v645_v0 }
  0x40   :  { %468 = vmatpush3.bf16.msra.mxu1 %v518_v7 }
  0x41   :  { %469 = vmatprep.subr.bf16.mxu1 %v645_v0  ;;  %484 = vmatpush3.bf16.msra.mxu0 %v524_v13 }
  0x42   :  { %485 = vmatprep.subr.bf16.mxu0 %v645_v0 }
  0x44   :  { %470 = vmatpush3.bf16.msra.mxu1 %v519_v8 }
  0x45   :  { %471 = vmatprep.subr.bf16.mxu1 %v645_v0  ;;  %486 = vmatpush3.bf16.msra.mxu0 %v525_v14 }
  0x46   :  { %487 = vmatprep.subr.bf16.mxu0 %v645_v0 }
  0x48   :  { %472 = vmatpush3.bf16.msra.mxu1 %v520_v9 }
  0x49   :  { %473 = vmatprep.subr.bf16.mxu1 %v645_v0  ;;  %488 = vmatpush3.bf16.msra.mxu0 %v526_v15 }
  0x4a   :  { %489 = vmatprep.subr.bf16.mxu0 %v645_v0 }
  0x4c   :  { %474 = vmatpush3.bf16.msra.mxu1 %v521_v10 }
  0x4d   :  { %475 = vmatprep.subr.bf16.mxu1 %v645_v0  ;;  %490 = vmatpush3.bf16.msra.mxu0 %v527_v16 }
  0x4e   :  { %491 = vmatprep.subr.bf16.mxu0 %v645_v0 }
  0x50   :  { %476 = vmatpush3.bf16.msra.mxu1 %v522_v11 }
  0x51   :  { %492 = vmatpush3.bf16.msra.mxu0 %v528_v27 }
  0x52   :  { %493 = vmatprep.subr.bf16.mxu0 %v645_v0 }
  0x55   :  { %494 = vmatpush3.bf16.msra.mxu0 %v529_v28 }
  0x56   :  { %495 = vmatprep.subr.bf16.mxu0 %v645_v0 }
  0x59   :  { %496 = vmatpush3.bf16.msra.mxu0 %v530_v29 }
  0xfb   :  { %v151_v18 = vpop.f32.mrf.mxu0 }
  0xfc   :  { %v152_v20 = vadd.f32 %v409_v17, %v151_v18 }
  0xfd   :  { %v459_v19 = vpop.f32.mrf.mxu0 }
  0xfe   :  { %v158_v24 = vmax.f32 %v152_v20, 0.0 }
  0xff   :  { %v154_v21 = vpop.f32.mrf.mxu0 }
 0x100   :  { %v155_v22 = vadd.f32 %v409_v17, %v154_v21 }
 0x101   :  { %v460_v23 = vpop.f32.mrf.mxu0 }
 0x102   :  { %v159_v25 = vmax.f32 %v155_v22, 0.0 }
 0x104   :  { %v160_v26 = vpack.c.bf16 %v159_v25, %v158_v24 }
 0x106   :  { %478 = vmatmul.mubr.bf16.vlgmr.msra.gmra.mxu1 %v160_v26 }
 0x1c6   :  { %v266_v31 = vpop.f32.mrf.mxu1 }
 0x1c7   :  { %v267_v33 = vadd.f32 %v414_v30, %v266_v31 }
 0x1c8   :  { %v479_v32 = vpop.f32.mrf.mxu1 }
 0x1c9   :  { %v273_v37 = vmax.f32 %v267_v33, 0.0 }
 0x1ca   :  { %v269_v34 = vpop.f32.mrf.mxu1 }
 0x1cb   :  { %v270_v35 = vadd.f32 %v414_v30, %v269_v34 }
 0x1cc   :  { %v480_v36 = vpop.f32.mrf.mxu1 }
 0x1cd   :  { %v274_v38 = vmax.f32 %v270_v35, 0.0 }
 0x1cf   :  { %v275_v39 = vpack.c.bf16 %v274_v38, %v273_v37 }
 0x1d1   :  { %498 = vmatmul.mubr.bf16.vlgmr.msra.gmra.mxu0 %v275_v39 }
 0x291   :  { %v381_v41 = vpop.f32.mrf.mxu0 }
 0x292   :  { %v382_v42 = vadd.f32 %v423_v40, %v381_v41 }
 0x293   :  { %v499_v43 = vpop.f32.mrf.mxu0 }
 0x294   :  { %388 = vst [vmem:[#allocation10] sm:$0xff] %v382_v42 }
 0x295   :  { %v384_v44 = vpop.f32.mrf.mxu0 }
 0x296   :  { %v385_v45 = vadd.f32 %v423_v40, %v384_v44 }
 0x297   :  { %v500_v46 = vpop.f32.mrf.mxu0 }
 0x298   :  { %389 = vst [vmem:[#allocation10 + $0x8] sm:$0xff] %v385_v45 }
 0x299   :  { %622 = shalt.err (!%p619_p10)
}
 0x29a   :  { %s648_s26 = smov 128   ;;  %s649_s6 = smov 8  }
 0x29b   :  { %401 = dma.vmem_to_hbm [thread:$0]  %s396_s25, 256, %s757_s7, [#allocation4], %s648_s26, %s648_s26, %s649_s6  }
 0x29c   :  { %637 = dma.done.wait [#allocation4], 256  }
 0x29d   :  { %638 = vsyncadd [#allocation4], 4294967040 }
 0x29e   :  { %405 = vsyncpa [#allocation3], 1 }
 0x29f   :  { %406 = vsyncpa [#allocation6], 1 }
 0x2a0   :  { %407 = vsyncpa [#allocation9], 1 }
 0x2a1   :  { %408 = vsyncpa [#allocation4], 1 }

</bundles_post_ra>
